<compile_context>
chip_gen: v6e
topology: v6e:2x2x1
jax: 0.10.0
libtpu: 0.0.40
codegen_flags: <defaults>
</compile_context>

<pallas_src>
import math
import jax
import jax.numpy as jnp
from jax.experimental import pallas as pl
from jax.experimental.pallas import tpu as pltpu

# ---- small config consistent with the module ----
B = 2             # batch
S = 8             # seq_len
H = 32            # hidden_size
NH = 4            # num_attention_heads
NKV = 2           # num_key_value_heads
HD = H // NH      # head_dim = 8
NREP = NH // NKV  # num_key_value_groups
I = 64            # intermediate_size
EPS = 1e-6        # rms_norm_eps
ROPE_BASE = 10000.0
LAYER_INDEX = 1   # != 0 -> input_layernorm is applied
BS = B * S

HIGHEST = jax.lax.Precision.HIGHEST


def _decoder_layer_kernel(x_ref, mask_ref, rope_ref, ln_ref,
                          wqkv_ref, wo_ref, wgu_ref, wd_ref, o_ref):
    x = x_ref[...]                       # [BS, H] f32
    mask = mask_ref[...]                 # [B, S, S] f32 additive mask
    rope = rope_ref[...]                 # [2, BS, H] f32 (cos | sin, per-head tiled)
    cosf, sinf = rope[0], rope[1]
    lnw = ln_ref[...]                    # [2, H] f32

    def mm(a, w):                        # bf16 MXU matmul, f32 accumulate
        return jnp.dot(a.astype(jnp.bfloat16), w,
                       preferred_element_type=jnp.float32)

    def rms(h, w_row):                   # RMSNorm in f32 (v5e-friendly elementwise)
        var = jnp.mean(h * h, axis=-1, keepdims=True)
        return (h * jax.lax.rsqrt(var + EPS)) * w_row

    # ---- input RMSNorm (self.index != 0) ----
    hs = rms(x, lnw[0:1, :])

    # ---- fused projection: columns = [q | rotate_half(q) | k | rotate_half(k) | v]
    # (GQA expansion of K/V and rotate_half are folded into the weight in the wrapper)
    qkv = mm(hs, wqkv_ref[...])          # [BS, 5H] f32
    q, q_rh = qkv[:, 0 * H:1 * H], qkv[:, 1 * H:2 * H]
    k, k_rh = qkv[:, 2 * H:3 * H], qkv[:, 3 * H:4 * H]
    v = qkv[:, 4 * H:5 * H]

    # ---- RoPE: pure elementwise FMA with pre-tiled cos/sin ----
    q_emb = q * cosf + q_rh * sinf       # [BS, H]
    k_emb = k * cosf + k_rh * sinf       # [BS, H]

    # ---- attention: static unroll over heads, batched over B via 3-D einsums ----
    scale = 1.0 / math.sqrt(HD)
    head_outs = []
    for h in range(NH):
        sl = slice(h * HD, (h + 1) * HD)
        qh = q_emb[:, sl].reshape(B, S, HD).astype(jnp.bfloat16)
        kh = k_emb[:, sl].reshape(B, S, HD).astype(jnp.bfloat16)
        vh = v[:, sl].reshape(B, S, HD).astype(jnp.bfloat16)
        s = jnp.einsum('bqd,bkd->bqk', qh, kh,
                       preferred_element_type=jnp.float32) * scale + mask
        p = jax.nn.softmax(s, axis=-1)                       # f32 softmax
        oh = jnp.einsum('bqk,bkd->bqd', p.astype(jnp.bfloat16), vh,
                        preferred_element_type=jnp.float32)  # [B, S, HD]
        head_outs.append(oh.reshape(BS, HD))
    attn = jnp.concatenate(head_outs, axis=-1)               # [BS, H]
    attn = mm(attn, wo_ref[...])                             # o_proj

    h1 = x + attn                                            # residual

    # ---- post-attention RMSNorm + SwiGLU MLP (gate/up fused) ----
    h2 = rms(h1, lnw[1:2, :])
    gu = mm(h2, wgu_ref[...])                                # [BS, 2I] = [16, 128]
    inter = jax.nn.silu(gu[:, :I]) * gu[:, I:]
    down = mm(inter, wd_ref[...])

    o_ref[...] = (h1 + down).astype(o_ref.dtype)             # residual


def eagle_decoder_layer(x, mask, cos, sin, params):
    """x: [B,S,H] f32, mask: [B,1,S,S] additive, cos/sin: [S,HD], params in PyTorch layout."""
    ln1, ln2, wq, wk, wv, wo, wg, wu, wd = params

    def expand_kv(w):                    # [NKV*HD, H] -> [NH*HD, H]; head h uses kv h//NREP
        return jnp.repeat(w.reshape(NKV, HD, H), NREP, axis=0).reshape(NH * HD, H)

    def rotate_half_rows(w):             # rotate_half applied to output features, per head
        w4 = w.reshape(NH, HD, H)
        return jnp.concatenate([-w4[:, HD // 2:, :], w4[:, :HD // 2, :]],
                               axis=1).reshape(NH * HD, H)

    wk_e, wv_e = expand_kv(wk), expand_kv(wv)
    w_qkv = jnp.concatenate(
        [wq, rotate_half_rows(wq), wk_e, rotate_half_rows(wk_e), wv_e],
        axis=0).T.astype(jnp.bfloat16)                            # [H, 5H] = [32, 160]
    w_o = wo.T.astype(jnp.bfloat16)                               # [NH*HD, H]
    w_gu = jnp.concatenate([wg, wu], axis=0).T.astype(jnp.bfloat16)  # [H, 2I] = [32, 128]
    w_d = wd.T.astype(jnp.bfloat16)                               # [I, H]

    # cos/sin tiled per head and per batch row: row b*S+s, col h*HD+d -> cos[s, d]
    rope = jnp.stack([jnp.tile(cos, (B, NH)), jnp.tile(sin, (B, NH))], axis=0)  # [2, BS, H]
    ln = jnp.concatenate([ln1.reshape(1, H), ln2.reshape(1, H)], axis=0)        # [2, H]

    x2 = x.reshape(BS, H)
    mask2 = mask.reshape(B, S, S)

    out = pl.pallas_call(
        _decoder_layer_kernel,
        out_shape=jax.ShapeDtypeStruct((BS, H), x.dtype),
        grid=(1,),                                            # batch grid collapsed
        in_specs=[
            pl.BlockSpec((BS, H), lambda i: (0, 0)),          # hidden_states (flattened)
            pl.BlockSpec((B, S, S), lambda i: (0, 0, 0)),     # attention mask
            pl.BlockSpec((2, BS, H), lambda i: (0, 0, 0)),    # packed cos/sin table
            pl.BlockSpec((2, H), lambda i: (0, 0)),           # packed RMSNorm weights
            pl.BlockSpec((H, 5 * H), lambda i: (0, 0)),       # fused qkv (+rot-half) proj
            pl.BlockSpec((NH * HD, H), lambda i: (0, 0)),     # o_proj (pre-transposed)
            pl.BlockSpec((H, 2 * I), lambda i: (0, 0)),       # fused gate+up proj
            pl.BlockSpec((I, H), lambda i: (0, 0)),           # down_proj (pre-transposed)
        ],
        out_specs=pl.BlockSpec((BS, H), lambda i: (0, 0)),
        compiler_params=pltpu.CompilerParams(dimension_semantics=("arbitrary",)),
    )(x2, mask2, rope, ln, w_qkv, w_o, w_gu, w_d)
    return out.reshape(B, S, H)


# ---- rotary cache (matches EAGLERotaryEmbedding with rope_scaling=None) ----
def rope_cache(seq_len, dim, base=ROPE_BASE):
    inv_freq = 1.0 / (base ** (jnp.arange(0, dim, 2, dtype=jnp.float32) / dim))
    t = jnp.arange(seq_len, dtype=jnp.float32)
    freqs = jnp.outer(t, inv_freq)
    emb = jnp.concatenate([freqs, freqs], axis=-1)
    return jnp.cos(emb), jnp.sin(emb)          # [seq_len, dim] each
    # position_ids = arange(S) -> gathering rows is identity here


# ---- pure-JAX reference mirroring the PyTorch forward (f32, HIGHEST precision) ----
def reference(x, mask, cos, sin, params):
    ln1, ln2, wq, wk, wv, wo, wg, wu, wd = params

    def rms(h, w):
        hf = h.astype(jnp.float32)
        var = jnp.mean(hf * hf, axis=-1, keepdims=True)
        return w[0] * (hf * jax.lax.rsqrt(var + EPS))

    def mm(a, b):
        return jnp.matmul(a, b, precision=HIGHEST)

    res = x
    hs = rms(x, ln1) if LAYER_INDEX != 0 else x
    q = mm(hs, wq.T).reshape(B, S, NH, HD).transpose(0, 2, 1, 3)
    k = mm(hs, wk.T).reshape(B, S, NKV, HD).transpose(0, 2, 1, 3)
    v = mm(hs, wv.T).reshape(B, S, NKV, HD).transpose(0, 2, 1, 3)
    c, s = cos[None, None], sin[None, None]

    def rh(t):
        return jnp.concatenate([-t[..., HD // 2:], t[..., : HD // 2]], -1)

    q = q * c + rh(q) * s
    k = k * c + rh(k) * s
    k = jnp.repeat(k, NREP, axis=1)
    v = jnp.repeat(v, NREP, axis=1)
    scores = jnp.einsum('bhqd,bhkd->bhqk', q, k, precision=HIGHEST) / math.sqrt(HD) + mask
    probs = jax.nn.softmax(scores.astype(jnp.float32), axis=-1)
    attn = jnp.einsum('bhqk,bhkd->bhqd', probs, v, precision=HIGHEST)
    attn = mm(attn.transpose(0, 2, 1, 3).reshape(B, S, H), wo.T)
    h1 = res + attn
    h2 = rms(h1, ln2)
    out = h1 + mm(jax.nn.silu(mm(h2, wg.T)) * mm(h2, wu.T), wd.T)
    return out


if __name__ == "__main__":
    key = jax.random.PRNGKey(0)
    ks = jax.random.split(key, 10)

    x = jax.random.normal(ks[0], (B, S, H), jnp.float32)

    # causal attention mask [B, 1, S, S] with large negatives above the diagonal
    causal = jnp.where(jnp.tril(jnp.ones((S, S), bool)), 0.0, -1e9).astype(jnp.float32)
    mask = jnp.broadcast_to(causal, (B, 1, S, S))

    cos, sin = rope_cache(S, HD)

    scale = 0.05
    params = (
        jnp.ones((1, H), jnp.float32),                                  # input_layernorm.weight
        jnp.ones((1, H), jnp.float32),                                  # post_attention_layernorm.weight
        scale * jax.random.normal(ks[1], (NH * HD, H), jnp.float32),    # q_proj.weight
        scale * jax.random.normal(ks[2], (NKV * HD, H), jnp.float32),   # k_proj.weight
        scale * jax.random.normal(ks[3], (NKV * HD, H), jnp.float32),   # v_proj.weight
        scale * jax.random.normal(ks[4], (H, NH * HD), jnp.float32),    # o_proj.weight
        scale * jax.random.normal(ks[5], (I, H), jnp.float32),          # gate_proj.weight
        scale * jax.random.normal(ks[6], (I, H), jnp.float32),          # up_proj.weight
        scale * jax.random.normal(ks[7], (H, I), jnp.float32),          # down_proj.weight
    )

    out = eagle_decoder_layer(x, mask, cos, sin, params)
    out = jax.block_until_ready(out)

    ref = jax.block_until_ready(reference(x, mask, cos, sin, params))
    assert out.shape == (B, S, H)
    assert bool(jnp.all(jnp.isfinite(out)))
    # bf16 MXU operands with f32 accumulation -> compare with a matching tolerance
    assert bool(jnp.allclose(out, ref, atol=2e-2, rtol=2e-2)), "mismatch vs reference"

    print("KERNEL_OK")
</pallas_src>

<mosaic_0001>
module attributes {stable_mosaic.version = 11 : i64} {
  func.func @_decoder_layer_kernel(%arg0: i32, %arg1: memref<16x32xf32, #tpu.memory_space<vmem>>, %arg2: memref<2x8x8xf32, #tpu.memory_space<vmem>>, %arg3: memref<2x16x32xf32, #tpu.memory_space<vmem>>, %arg4: memref<2x32xf32, #tpu.memory_space<vmem>>, %arg5: memref<32x160xbf16, #tpu.memory_space<vmem>>, %arg6: memref<32x32xbf16, #tpu.memory_space<vmem>>, %arg7: memref<32x128xbf16, #tpu.memory_space<vmem>>, %arg8: memref<64x32xbf16, #tpu.memory_space<vmem>>, %arg9: memref<16x32xf32, #tpu.memory_space<vmem>>) attributes {dimension_semantics = [#tpu.dimension_semantics<arbitrary>], iteration_bounds = array<i64: 1>, scalar_prefetch = 0 : i64, scratch_operands = 0 : i64, tpu.core_type = #tpu.core_type<tc>, window_params = [{pipeline_mode = #tpu.pipeline_mode<synchronous>, transform_indices = @transform_0, window_bounds = array<i64: 16, 32>}, {pipeline_mode = #tpu.pipeline_mode<synchronous>, transform_indices = @transform_1, window_bounds = array<i64: 2, 8, 8>}, {pipeline_mode = #tpu.pipeline_mode<synchronous>, transform_indices = @transform_2, window_bounds = array<i64: 2, 16, 32>}, {pipeline_mode = #tpu.pipeline_mode<synchronous>, transform_indices = @transform_3, window_bounds = array<i64: 2, 32>}, {pipeline_mode = #tpu.pipeline_mode<synchronous>, transform_indices = @transform_4, window_bounds = array<i64: 32, 160>}, {pipeline_mode = #tpu.pipeline_mode<synchronous>, transform_indices = @transform_5, window_bounds = array<i64: 32, 32>}, {pipeline_mode = #tpu.pipeline_mode<synchronous>, transform_indices = @transform_6, window_bounds = array<i64: 32, 128>}, {pipeline_mode = #tpu.pipeline_mode<synchronous>, transform_indices = @transform_7, window_bounds = array<i64: 64, 32>}, {pipeline_mode = #tpu.pipeline_mode<synchronous>, transform_indices = @transform_8, window_bounds = array<i64: 16, 32>}]} {
    %c0 = arith.constant 0 : index
    %c0_0 = arith.constant 0 : index
    %0 = vector.load %arg1[%c0, %c0_0] : memref<16x32xf32, #tpu.memory_space<vmem>>, vector<16x32xf32>
    %c0_1 = arith.constant 0 : index
    %c0_2 = arith.constant 0 : index
    %c0_3 = arith.constant 0 : index
    %1 = vector.load %arg2[%c0_1, %c0_2, %c0_3] : memref<2x8x8xf32, #tpu.memory_space<vmem>>, vector<2x8x8xf32>
    %c0_4 = arith.constant 0 : index
    %c0_5 = arith.constant 0 : index
    %c0_6 = arith.constant 0 : index
    %2 = vector.load %arg3[%c0_4, %c0_5, %c0_6] : memref<2x16x32xf32, #tpu.memory_space<vmem>>, vector<2x16x32xf32>
    %3 = vector.extract_strided_slice %2 {offsets = [0, 0, 0], sizes = [1, 16, 32], strides = [1, 1, 1]} : vector<2x16x32xf32> to vector<1x16x32xf32>
    %4 = vector.shape_cast %3 : vector<1x16x32xf32> to vector<16x32xf32>
    %5 = vector.extract_strided_slice %2 {offsets = [1, 0, 0], sizes = [1, 16, 32], strides = [1, 1, 1]} : vector<2x16x32xf32> to vector<1x16x32xf32>
    %6 = vector.shape_cast %5 : vector<1x16x32xf32> to vector<16x32xf32>
    %c0_7 = arith.constant 0 : index
    %c0_8 = arith.constant 0 : index
    %7 = vector.load %arg4[%c0_7, %c0_8] : memref<2x32xf32, #tpu.memory_space<vmem>>, vector<2x32xf32>
    %8 = vector.extract_strided_slice %7 {offsets = [0, 0], sizes = [1, 32], strides = [1, 1]} : vector<2x32xf32> to vector<1x32xf32>
    %9 = arith.mulf %0, %0 : vector<16x32xf32>
    %cst = arith.constant dense<0.000000e+00> : vector<16xf32>
    %10 = vector.multi_reduction <add>, %9, %cst [1] : vector<16x32xf32> to vector<16xf32>
    %11 = vector.shape_cast %10 : vector<16xf32> to vector<16x1xf32>
    %cst_9 = arith.constant 3.200000e+01 : f32
    %12 = vector.broadcast %cst_9 : f32 to vector<16x1xf32>
    %13 = arith.divf %11, %12 : vector<16x1xf32>
    %cst_10 = arith.constant 9.99999997E-7 : f32
    %14 = vector.broadcast %cst_10 : f32 to vector<16x1xf32>
    %15 = arith.addf %13, %14 : vector<16x1xf32>
    %16 = math.rsqrt %15 : vector<16x1xf32>
    %17 = vector.broadcast %16 : vector<16x1xf32> to vector<16x32xf32>
    %18 = arith.mulf %0, %17 : vector<16x32xf32>
    %19 = vector.broadcast %8 : vector<1x32xf32> to vector<16x32xf32>
    %20 = arith.mulf %18, %19 : vector<16x32xf32>
    %c0_11 = arith.constant 0 : index
    %c0_12 = arith.constant 0 : index
    %21 = vector.load %arg5[%c0_11, %c0_12] : memref<32x160xbf16, #tpu.memory_space<vmem>>, vector<32x160xbf16>
    %22 = arith.truncf %20 : vector<16x32xf32> to vector<16x32xbf16>
    %cst_13 = arith.constant dense<0.000000e+00> : vector<16x160xf32>
    %23 = tpu.matmul %22, %21, %cst_13 {dimension_numbers = #tpu.dot_dimension_numbers<[1], [0], [0], [1], [0, 0, 1, 1], [], []>} : vector<16x32xbf16>, vector<32x160xbf16>, vector<16x160xf32> -> vector<16x160xf32>
    %24 = vector.extract_strided_slice %23 {offsets = [0, 0], sizes = [16, 32], strides = [1, 1]} : vector<16x160xf32> to vector<16x32xf32>
    %25 = vector.extract_strided_slice %23 {offsets = [0, 32], sizes = [16, 32], strides = [1, 1]} : vector<16x160xf32> to vector<16x32xf32>
    %26 = vector.extract_strided_slice %23 {offsets = [0, 64], sizes = [16, 32], strides = [1, 1]} : vector<16x160xf32> to vector<16x32xf32>
    %27 = vector.extract_strided_slice %23 {offsets = [0, 96], sizes = [16, 32], strides = [1, 1]} : vector<16x160xf32> to vector<16x32xf32>
    %28 = vector.extract_strided_slice %23 {offsets = [0, 128], sizes = [16, 32], strides = [1, 1]} : vector<16x160xf32> to vector<16x32xf32>
    %29 = arith.mulf %24, %4 : vector<16x32xf32>
    %30 = arith.mulf %25, %6 : vector<16x32xf32>
    %31 = arith.addf %29, %30 : vector<16x32xf32>
    %32 = arith.mulf %26, %4 : vector<16x32xf32>
    %33 = arith.mulf %27, %6 : vector<16x32xf32>
    %34 = arith.addf %32, %33 : vector<16x32xf32>
    %35 = vector.extract_strided_slice %31 {offsets = [0, 0], sizes = [16, 8], strides = [1, 1]} : vector<16x32xf32> to vector<16x8xf32>
    %36 = vector.shape_cast %35 : vector<16x8xf32> to vector<2x8x8xf32>
    %37 = arith.truncf %36 : vector<2x8x8xf32> to vector<2x8x8xbf16>
    %38 = vector.extract_strided_slice %34 {offsets = [0, 0], sizes = [16, 8], strides = [1, 1]} : vector<16x32xf32> to vector<16x8xf32>
    %39 = vector.shape_cast %38 : vector<16x8xf32> to vector<2x8x8xf32>
    %40 = arith.truncf %39 : vector<2x8x8xf32> to vector<2x8x8xbf16>
    %41 = vector.extract_strided_slice %28 {offsets = [0, 0], sizes = [16, 8], strides = [1, 1]} : vector<16x32xf32> to vector<16x8xf32>
    %42 = vector.shape_cast %41 : vector<16x8xf32> to vector<2x8x8xf32>
    %43 = arith.truncf %42 : vector<2x8x8xf32> to vector<2x8x8xbf16>
    "tpu.trace_start"() <{level = 10 : i32, message = "bqd,bkd->bqk"}> : () -> ()
    %cst_14 = arith.constant dense<0.000000e+00> : vector<2x8x8xf32>
    %44 = tpu.matmul %37, %40, %cst_14 {dimension_numbers = #tpu.dot_dimension_numbers<[2], [2], [1], [1], [0, 0, 0, 1, 1, 1], [0], [0]>} : vector<2x8x8xbf16>, vector<2x8x8xbf16>, vector<2x8x8xf32> -> vector<2x8x8xf32>
    "tpu.trace_stop"() : () -> ()
    %cst_15 = arith.constant 0.353553385 : f32
    %45 = vector.broadcast %cst_15 : f32 to vector<2x8x8xf32>
    %46 = arith.mulf %44, %45 : vector<2x8x8xf32>
    %47 = arith.addf %46, %1 : vector<2x8x8xf32>
    %cst_16 = arith.constant dense<0xFF800000> : vector<2x8xf32>
    %48 = vector.multi_reduction <maximumf>, %47, %cst_16 [2] : vector<2x8x8xf32> to vector<2x8xf32>
    %cst_17 = arith.constant 0xFF800000 : f32
    %49 = vector.broadcast %cst_17 : f32 to vector<2x8xf32>
    %50 = arith.maximumf %49, %48 : vector<2x8xf32>
    %51 = vector.shape_cast %50 : vector<2x8xf32> to vector<2x8x1xf32>
    %52 = vector.broadcast %51 : vector<2x8x1xf32> to vector<2x8x8xf32>
    %53 = arith.subf %47, %52 : vector<2x8x8xf32>
    %54 = math.exp %53 : vector<2x8x8xf32>
    %cst_18 = arith.constant dense<0.000000e+00> : vector<2x8xf32>
    %55 = vector.multi_reduction <add>, %54, %cst_18 [2] : vector<2x8x8xf32> to vector<2x8xf32>
    %56 = vector.shape_cast %55 : vector<2x8xf32> to vector<2x8x1xf32>
    %57 = vector.broadcast %56 : vector<2x8x1xf32> to vector<2x8x8xf32>
    %58 = arith.divf %54, %57 : vector<2x8x8xf32>
    %59 = arith.truncf %58 : vector<2x8x8xf32> to vector<2x8x8xbf16>
    "tpu.trace_start"() <{level = 10 : i32, message = "bqk,bkd->bqd"}> : () -> ()
    %cst_19 = arith.constant dense<0.000000e+00> : vector<2x8x8xf32>
    %60 = tpu.matmul %59, %43, %cst_19 {dimension_numbers = #tpu.dot_dimension_numbers<[2], [1], [1], [2], [0, 0, 0, 1, 1, 2], [0], [0]>} : vector<2x8x8xbf16>, vector<2x8x8xbf16>, vector<2x8x8xf32> -> vector<2x8x8xf32>
    "tpu.trace_stop"() : () -> ()
    %61 = vector.shape_cast %60 : vector<2x8x8xf32> to vector<16x8xf32>
    %62 = vector.extract_strided_slice %31 {offsets = [0, 8], sizes = [16, 8], strides = [1, 1]} : vector<16x32xf32> to vector<16x8xf32>
    %63 = vector.shape_cast %62 : vector<16x8xf32> to vector<2x8x8xf32>
    %64 = arith.truncf %63 : vector<2x8x8xf32> to vector<2x8x8xbf16>
    %65 = vector.extract_strided_slice %34 {offsets = [0, 8], sizes = [16, 8], strides = [1, 1]} : vector<16x32xf32> to vector<16x8xf32>
    %66 = vector.shape_cast %65 : vector<16x8xf32> to vector<2x8x8xf32>
    %67 = arith.truncf %66 : vector<2x8x8xf32> to vector<2x8x8xbf16>
    %68 = vector.extract_strided_slice %28 {offsets = [0, 8], sizes = [16, 8], strides = [1, 1]} : vector<16x32xf32> to vector<16x8xf32>
    %69 = vector.shape_cast %68 : vector<16x8xf32> to vector<2x8x8xf32>
    %70 = arith.truncf %69 : vector<2x8x8xf32> to vector<2x8x8xbf16>
    "tpu.trace_start"() <{level = 10 : i32, message = "bqd,bkd->bqk"}> : () -> ()
    %cst_20 = arith.constant dense<0.000000e+00> : vector<2x8x8xf32>
    %71 = tpu.matmul %64, %67, %cst_20 {dimension_numbers = #tpu.dot_dimension_numbers<[2], [2], [1], [1], [0, 0, 0, 1, 1, 1], [0], [0]>} : vector<2x8x8xbf16>, vector<2x8x8xbf16>, vector<2x8x8xf32> -> vector<2x8x8xf32>
    "tpu.trace_stop"() : () -> ()
    %cst_21 = arith.constant 0.353553385 : f32
    %72 = vector.broadcast %cst_21 : f32 to vector<2x8x8xf32>
    %73 = arith.mulf %71, %72 : vector<2x8x8xf32>
    %74 = arith.addf %73, %1 : vector<2x8x8xf32>
    %cst_22 = arith.constant dense<0xFF800000> : vector<2x8xf32>
    %75 = vector.multi_reduction <maximumf>, %74, %cst_22 [2] : vector<2x8x8xf32> to vector<2x8xf32>
    %cst_23 = arith.constant 0xFF800000 : f32
    %76 = vector.broadcast %cst_23 : f32 to vector<2x8xf32>
    %77 = arith.maximumf %76, %75 : vector<2x8xf32>
    %78 = vector.shape_cast %77 : vector<2x8xf32> to vector<2x8x1xf32>
    %79 = vector.broadcast %78 : vector<2x8x1xf32> to vector<2x8x8xf32>
    %80 = arith.subf %74, %79 : vector<2x8x8xf32>
    %81 = math.exp %80 : vector<2x8x8xf32>
    %cst_24 = arith.constant dense<0.000000e+00> : vector<2x8xf32>
    %82 = vector.multi_reduction <add>, %81, %cst_24 [2] : vector<2x8x8xf32> to vector<2x8xf32>
    %83 = vector.shape_cast %82 : vector<2x8xf32> to vector<2x8x1xf32>
    %84 = vector.broadcast %83 : vector<2x8x1xf32> to vector<2x8x8xf32>
    %85 = arith.divf %81, %84 : vector<2x8x8xf32>
    %86 = arith.truncf %85 : vector<2x8x8xf32> to vector<2x8x8xbf16>
    "tpu.trace_start"() <{level = 10 : i32, message = "bqk,bkd->bqd"}> : () -> ()
    %cst_25 = arith.constant dense<0.000000e+00> : vector<2x8x8xf32>
    %87 = tpu.matmul %86, %70, %cst_25 {dimension_numbers = #tpu.dot_dimension_numbers<[2], [1], [1], [2], [0, 0, 0, 1, 1, 2], [0], [0]>} : vector<2x8x8xbf16>, vector<2x8x8xbf16>, vector<2x8x8xf32> -> vector<2x8x8xf32>
    "tpu.trace_stop"() : () -> ()
    %88 = vector.shape_cast %87 : vector<2x8x8xf32> to vector<16x8xf32>
    %89 = vector.extract_strided_slice %31 {offsets = [0, 16], sizes = [16, 8], strides = [1, 1]} : vector<16x32xf32> to vector<16x8xf32>
    %90 = vector.shape_cast %89 : vector<16x8xf32> to vector<2x8x8xf32>
    %91 = arith.truncf %90 : vector<2x8x8xf32> to vector<2x8x8xbf16>
    %92 = vector.extract_strided_slice %34 {offsets = [0, 16], sizes = [16, 8], strides = [1, 1]} : vector<16x32xf32> to vector<16x8xf32>
    %93 = vector.shape_cast %92 : vector<16x8xf32> to vector<2x8x8xf32>
    %94 = arith.truncf %93 : vector<2x8x8xf32> to vector<2x8x8xbf16>
    %95 = vector.extract_strided_slice %28 {offsets = [0, 16], sizes = [16, 8], strides = [1, 1]} : vector<16x32xf32> to vector<16x8xf32>
    %96 = vector.shape_cast %95 : vector<16x8xf32> to vector<2x8x8xf32>
    %97 = arith.truncf %96 : vector<2x8x8xf32> to vector<2x8x8xbf16>
    "tpu.trace_start"() <{level = 10 : i32, message = "bqd,bkd->bqk"}> : () -> ()
    %cst_26 = arith.constant dense<0.000000e+00> : vector<2x8x8xf32>
    %98 = tpu.matmul %91, %94, %cst_26 {dimension_numbers = #tpu.dot_dimension_numbers<[2], [2], [1], [1], [0, 0, 0, 1, 1, 1], [0], [0]>} : vector<2x8x8xbf16>, vector<2x8x8xbf16>, vector<2x8x8xf32> -> vector<2x8x8xf32>
    "tpu.trace_stop"() : () -> ()
    %cst_27 = arith.constant 0.353553385 : f32
    %99 = vector.broadcast %cst_27 : f32 to vector<2x8x8xf32>
    %100 = arith.mulf %98, %99 : vector<2x8x8xf32>
    %101 = arith.addf %100, %1 : vector<2x8x8xf32>
    %cst_28 = arith.constant dense<0xFF800000> : vector<2x8xf32>
    %102 = vector.multi_reduction <maximumf>, %101, %cst_28 [2] : vector<2x8x8xf32> to vector<2x8xf32>
    %cst_29 = arith.constant 0xFF800000 : f32
    %103 = vector.broadcast %cst_29 : f32 to vector<2x8xf32>
    %104 = arith.maximumf %103, %102 : vector<2x8xf32>
    %105 = vector.shape_cast %104 : vector<2x8xf32> to vector<2x8x1xf32>
    %106 = vector.broadcast %105 : vector<2x8x1xf32> to vector<2x8x8xf32>
    %107 = arith.subf %101, %106 : vector<2x8x8xf32>
    %108 = math.exp %107 : vector<2x8x8xf32>
    %cst_30 = arith.constant dense<0.000000e+00> : vector<2x8xf32>
    %109 = vector.multi_reduction <add>, %108, %cst_30 [2] : vector<2x8x8xf32> to vector<2x8xf32>
    %110 = vector.shape_cast %109 : vector<2x8xf32> to vector<2x8x1xf32>
    %111 = vector.broadcast %110 : vector<2x8x1xf32> to vector<2x8x8xf32>
    %112 = arith.divf %108, %111 : vector<2x8x8xf32>
    %113 = arith.truncf %112 : vector<2x8x8xf32> to vector<2x8x8xbf16>
    "tpu.trace_start"() <{level = 10 : i32, message = "bqk,bkd->bqd"}> : () -> ()
    %cst_31 = arith.constant dense<0.000000e+00> : vector<2x8x8xf32>
    %114 = tpu.matmul %113, %97, %cst_31 {dimension_numbers = #tpu.dot_dimension_numbers<[2], [1], [1], [2], [0, 0, 0, 1, 1, 2], [0], [0]>} : vector<2x8x8xbf16>, vector<2x8x8xbf16>, vector<2x8x8xf32> -> vector<2x8x8xf32>
    "tpu.trace_stop"() : () -> ()
    %115 = vector.shape_cast %114 : vector<2x8x8xf32> to vector<16x8xf32>
    %116 = vector.extract_strided_slice %31 {offsets = [0, 24], sizes = [16, 8], strides = [1, 1]} : vector<16x32xf32> to vector<16x8xf32>
    %117 = vector.shape_cast %116 : vector<16x8xf32> to vector<2x8x8xf32>
    %118 = arith.truncf %117 : vector<2x8x8xf32> to vector<2x8x8xbf16>
    %119 = vector.extract_strided_slice %34 {offsets = [0, 24], sizes = [16, 8], strides = [1, 1]} : vector<16x32xf32> to vector<16x8xf32>
    %120 = vector.shape_cast %119 : vector<16x8xf32> to vector<2x8x8xf32>
    %121 = arith.truncf %120 : vector<2x8x8xf32> to vector<2x8x8xbf16>
    %122 = vector.extract_strided_slice %28 {offsets = [0, 24], sizes = [16, 8], strides = [1, 1]} : vector<16x32xf32> to vector<16x8xf32>
    %123 = vector.shape_cast %122 : vector<16x8xf32> to vector<2x8x8xf32>
    %124 = arith.truncf %123 : vector<2x8x8xf32> to vector<2x8x8xbf16>
    "tpu.trace_start"() <{level = 10 : i32, message = "bqd,bkd->bqk"}> : () -> ()
    %cst_32 = arith.constant dense<0.000000e+00> : vector<2x8x8xf32>
    %125 = tpu.matmul %118, %121, %cst_32 {dimension_numbers = #tpu.dot_dimension_numbers<[2], [2], [1], [1], [0, 0, 0, 1, 1, 1], [0], [0]>} : vector<2x8x8xbf16>, vector<2x8x8xbf16>, vector<2x8x8xf32> -> vector<2x8x8xf32>
    "tpu.trace_stop"() : () -> ()
    %cst_33 = arith.constant 0.353553385 : f32
    %126 = vector.broadcast %cst_33 : f32 to vector<2x8x8xf32>
    %127 = arith.mulf %125, %126 : vector<2x8x8xf32>
    %128 = arith.addf %127, %1 : vector<2x8x8xf32>
    %cst_34 = arith.constant dense<0xFF800000> : vector<2x8xf32>
    %129 = vector.multi_reduction <maximumf>, %128, %cst_34 [2] : vector<2x8x8xf32> to vector<2x8xf32>
    %cst_35 = arith.constant 0xFF800000 : f32
    %130 = vector.broadcast %cst_35 : f32 to vector<2x8xf32>
    %131 = arith.maximumf %130, %129 : vector<2x8xf32>
    %132 = vector.shape_cast %131 : vector<2x8xf32> to vector<2x8x1xf32>
    %133 = vector.broadcast %132 : vector<2x8x1xf32> to vector<2x8x8xf32>
    %134 = arith.subf %128, %133 : vector<2x8x8xf32>
    %135 = math.exp %134 : vector<2x8x8xf32>
    %cst_36 = arith.constant dense<0.000000e+00> : vector<2x8xf32>
    %136 = vector.multi_reduction <add>, %135, %cst_36 [2] : vector<2x8x8xf32> to vector<2x8xf32>
    %137 = vector.shape_cast %136 : vector<2x8xf32> to vector<2x8x1xf32>
    %138 = vector.broadcast %137 : vector<2x8x1xf32> to vector<2x8x8xf32>
    %139 = arith.divf %135, %138 : vector<2x8x8xf32>
    %140 = arith.truncf %139 : vector<2x8x8xf32> to vector<2x8x8xbf16>
    "tpu.trace_start"() <{level = 10 : i32, message = "bqk,bkd->bqd"}> : () -> ()
    %cst_37 = arith.constant dense<0.000000e+00> : vector<2x8x8xf32>
    %141 = tpu.matmul %140, %124, %cst_37 {dimension_numbers = #tpu.dot_dimension_numbers<[2], [1], [1], [2], [0, 0, 0, 1, 1, 2], [0], [0]>} : vector<2x8x8xbf16>, vector<2x8x8xbf16>, vector<2x8x8xf32> -> vector<2x8x8xf32>
    "tpu.trace_stop"() : () -> ()
    %142 = vector.shape_cast %141 : vector<2x8x8xf32> to vector<16x8xf32>
    %143 = tpu.concatenate %61, %88, %115, %142 in 1 : vector<16x8xf32>, vector<16x8xf32>, vector<16x8xf32>, vector<16x8xf32> -> vector<16x32xf32>
    %c0_38 = arith.constant 0 : index
    %c0_39 = arith.constant 0 : index
    %144 = vector.load %arg6[%c0_38, %c0_39] : memref<32x32xbf16, #tpu.memory_space<vmem>>, vector<32x32xbf16>
    %145 = arith.truncf %143 : vector<16x32xf32> to vector<16x32xbf16>
    %cst_40 = arith.constant dense<0.000000e+00> : vector<16x32xf32>
    %146 = tpu.matmul %145, %144, %cst_40 {dimension_numbers = #tpu.dot_dimension_numbers<[1], [0], [0], [1], [0, 0, 1, 1], [], []>} : vector<16x32xbf16>, vector<32x32xbf16>, vector<16x32xf32> -> vector<16x32xf32>
    %147 = arith.addf %0, %146 : vector<16x32xf32>
    %148 = vector.extract_strided_slice %7 {offsets = [1, 0], sizes = [1, 32], strides = [1, 1]} : vector<2x32xf32> to vector<1x32xf32>
    %149 = arith.mulf %147, %147 : vector<16x32xf32>
    %cst_41 = arith.constant dense<0.000000e+00> : vector<16xf32>
    %150 = vector.multi_reduction <add>, %149, %cst_41 [1] : vector<16x32xf32> to vector<16xf32>
    %151 = vector.shape_cast %150 : vector<16xf32> to vector<16x1xf32>
    %cst_42 = arith.constant 3.200000e+01 : f32
    %152 = vector.broadcast %cst_42 : f32 to vector<16x1xf32>
    %153 = arith.divf %151, %152 : vector<16x1xf32>
    %cst_43 = arith.constant 9.99999997E-7 : f32
    %154 = vector.broadcast %cst_43 : f32 to vector<16x1xf32>
    %155 = arith.addf %153, %154 : vector<16x1xf32>
    %156 = math.rsqrt %155 : vector<16x1xf32>
    %157 = vector.broadcast %156 : vector<16x1xf32> to vector<16x32xf32>
    %158 = arith.mulf %147, %157 : vector<16x32xf32>
    %159 = vector.broadcast %148 : vector<1x32xf32> to vector<16x32xf32>
    %160 = arith.mulf %158, %159 : vector<16x32xf32>
    %c0_44 = arith.constant 0 : index
    %c0_45 = arith.constant 0 : index
    %161 = vector.load %arg7[%c0_44, %c0_45] : memref<32x128xbf16, #tpu.memory_space<vmem>>, vector<32x128xbf16>
    %162 = arith.truncf %160 : vector<16x32xf32> to vector<16x32xbf16>
    %cst_46 = arith.constant dense<0.000000e+00> : vector<16x128xf32>
    %163 = tpu.matmul %162, %161, %cst_46 {dimension_numbers = #tpu.dot_dimension_numbers<[1], [0], [0], [1], [0, 0, 1, 1], [], []>} : vector<16x32xbf16>, vector<32x128xbf16>, vector<16x128xf32> -> vector<16x128xf32>
    %164 = vector.extract_strided_slice %163 {offsets = [0, 0], sizes = [16, 64], strides = [1, 1]} : vector<16x128xf32> to vector<16x64xf32>
    %165 = arith.negf %164 : vector<16x64xf32>
    %166 = math.exp %165 : vector<16x64xf32>
    %cst_47 = arith.constant 1.000000e+00 : f32
    %167 = vector.broadcast %cst_47 : f32 to vector<16x64xf32>
    %168 = arith.addf %167, %166 : vector<16x64xf32>
    %169 = arith.divf %167, %168 : vector<16x64xf32>
    %170 = arith.mulf %164, %169 : vector<16x64xf32>
    %171 = vector.extract_strided_slice %163 {offsets = [0, 64], sizes = [16, 64], strides = [1, 1]} : vector<16x128xf32> to vector<16x64xf32>
    %172 = arith.mulf %170, %171 : vector<16x64xf32>
    %c0_48 = arith.constant 0 : index
    %c0_49 = arith.constant 0 : index
    %173 = vector.load %arg8[%c0_48, %c0_49] : memref<64x32xbf16, #tpu.memory_space<vmem>>, vector<64x32xbf16>
    %174 = arith.truncf %172 : vector<16x64xf32> to vector<16x64xbf16>
    %cst_50 = arith.constant dense<0.000000e+00> : vector<16x32xf32>
    %175 = tpu.matmul %174, %173, %cst_50 {dimension_numbers = #tpu.dot_dimension_numbers<[1], [0], [0], [1], [0, 0, 1, 1], [], []>} : vector<16x64xbf16>, vector<64x32xbf16>, vector<16x32xf32> -> vector<16x32xf32>
    %176 = arith.addf %147, %175 : vector<16x32xf32>
    %c0_51 = arith.constant 0 : index
    %c0_52 = arith.constant 0 : index
    %177 = vector.load %arg9[%c0_51, %c0_52] : memref<16x32xf32, #tpu.memory_space<vmem>>, vector<16x32xf32>
    tpu.vector_store %arg9[%c0_51, %c0_52], %176 {strides = array<i32>} : memref<16x32xf32, #tpu.memory_space<vmem>>, vector<16x32xf32>,
    return
  }
  func.func @transform_0(%arg0: i32) -> (i32, i32) {
    %c0_i32 = arith.constant 0 : i32
    %c0_i32_0 = arith.constant 0 : i32
    %c0_i32_1 = arith.constant 0 : i32
    return %c0_i32, %c0_i32_0 : i32, i32
  }
  func.func @transform_1(%arg0: i32) -> (i32, i32, i32) {
    %c0_i32 = arith.constant 0 : i32
    %c0_i32_0 = arith.constant 0 : i32
    %c0_i32_1 = arith.constant 0 : i32
    %c0_i32_2 = arith.constant 0 : i32
    return %c0_i32, %c0_i32_0, %c0_i32_1 : i32, i32, i32
  }
  func.func @transform_2(%arg0: i32) -> (i32, i32, i32) {
    %c0_i32 = arith.constant 0 : i32
    %c0_i32_0 = arith.constant 0 : i32
    %c0_i32_1 = arith.constant 0 : i32
    %c0_i32_2 = arith.constant 0 : i32
    return %c0_i32, %c0_i32_0, %c0_i32_1 : i32, i32, i32
  }
  func.func @transform_3(%arg0: i32) -> (i32, i32) {
    %c0_i32 = arith.constant 0 : i32
    %c0_i32_0 = arith.constant 0 : i32
    %c0_i32_1 = arith.constant 0 : i32
    return %c0_i32, %c0_i32_0 : i32, i32
  }
  func.func @transform_4(%arg0: i32) -> (i32, i32) {
    %c0_i32 = arith.constant 0 : i32
    %c0_i32_0 = arith.constant 0 : i32
    %c0_i32_1 = arith.constant 0 : i32
    return %c0_i32, %c0_i32_0 : i32, i32
  }
  func.func @transform_5(%arg0: i32) -> (i32, i32) {
    %c0_i32 = arith.constant 0 : i32
    %c0_i32_0 = arith.constant 0 : i32
    %c0_i32_1 = arith.constant 0 : i32
    return %c0_i32, %c0_i32_0 : i32, i32
  }
  func.func @transform_6(%arg0: i32) -> (i32, i32) {
    %c0_i32 = arith.constant 0 : i32
    %c0_i32_0 = arith.constant 0 : i32
    %c0_i32_1 = arith.constant 0 : i32
    return %c0_i32, %c0_i32_0 : i32, i32
  }
  func.func @transform_7(%arg0: i32) -> (i32, i32) {
    %c0_i32 = arith.constant 0 : i32
    %c0_i32_0 = arith.constant 0 : i32
    %c0_i32_1 = arith.constant 0 : i32
    return %c0_i32, %c0_i32_0 : i32, i32
  }
  func.func @transform_8(%arg0: i32) -> (i32, i32) {
    %c0_i32 = arith.constant 0 : i32
    %c0_i32_0 = arith.constant 0 : i32
    %c0_i32_1 = arith.constant 0 : i32
    return %c0_i32, %c0_i32_0 : i32, i32
  }
}

</mosaic_0001>

<bundles_post_ra>
// kernel: tpu_custom_call.1
= control target key start
LH: loop header
LB: loop body
LE: loop exit
PB: predicated region body
PF: predicated region fallthrough
CT: control target
= control target key end

     0   :  { %13 = vsyncpa [#allocation3], 0  ;;  %s2226_s0 = inlined_call_operand.vmem [shape: f32[16,32], index: 0, kind: input, shape index: {}]   ;;  %s2227_s1 = inlined_call_operand.hbm [shape: f32[2,8,8], index: 1, kind: input, shape index: {}]   ;;  %s2228_s2 = inlined_call_operand.vmem [shape: f32[2,16,32], index: 2, kind: input, shape index: {}]   ;;  %s2229_s3 = inlined_call_operand.vmem [shape: f32[2,32], index: 3, kind: input, shape index: {}]   ;;  %s2230_s4 = inlined_call_operand.hbm [shape: bf16[32,160], index: 4, kind: input, shape index: {}]   ;;  %s2231_s5 = inlined_call_operand.hbm [shape: bf16[32,32], index: 5, kind: input, shape index: {}]   ;;  %s2232_s6 = inlined_call_operand.hbm [shape: bf16[32,128], index: 6, kind: input, shape index: {}]   ;;  %s2233_s7 = inlined_call_operand.vmem [shape: bf16[64,32], index: 7, kind: input, shape index: {}]   ;;  %s2234_s8 = inlined_call_operand.hbm [shape: f32[16,32], index: 8, kind: output, shape index: {}]  }
   0x1   :  { %14 = vsyncpa [#allocation6], 0 }
   0x2   :  { %15 = vsyncpa [#allocation9], 0 }
   0x3   :  { %16 = vsyncpa [#allocation4], 0  ;;  %s1853_s27 = smov [#allocation5]   ;;  %s1854_s29 = smov [#allocation2]  }
   0x4   :  { %s40_s28 = sshll.u32 %s1853_s27, 4  ;;  %s24_s30 = sshll.u32 %s1854_s29, 4  ;;  %s41_s28 = int_to_ptr.vmem [resolvable:$true] %s40_s28  ;;  %s25_s30 = int_to_ptr.vmem [resolvable:$true] %s24_s30 }
   0x5   :  { %s1753_s9 = scalar_lea.vmem %s41_s28, 512  ;;  %p1758_p1 = scmp.lt.s32.totalorder %s41_s28, %s41_s28 }
   0x6   :  { %p1754_p0 = scmp.ne.s32.totalorder %s41_s28, %s1753_s9  ;;  %p1759_p2 = scmp.lt.s32.totalorder %s1753_s9, %s1753_s9 }
   0x8   :  { %p1760_p3 = por %p1759_p2, %p1758_p1 }
   0xa   :  { %p1761_p4 = pnand %p1760_p3, %p1754_p0 }
   0xc   :  { %1764 = shalt.err (!%p1761_p4)
}
   0xd   :  { %s1855_s10 = smov 128   ;;  %s1856_s11 = smov 8  }
   0xe   :  { %46 = dma.hbm_to_vmem [thread:$0]  %s2230_s4, 512, %s41_s28, [#allocation6], %s1855_s10, %s1855_s10, %s1856_s11  }
   0xf   :  { %s1773_s14 = scalar_lea.vmem %s25_s30, 256  ;;  %p1778_p6 = scmp.lt.s32.totalorder %s25_s30, %s25_s30 }
  0x10   :  { %p1774_p5 = scmp.ne.s32.totalorder %s25_s30, %s1773_s14  ;;  %p1779_p7 = scmp.lt.s32.totalorder %s1773_s14, %s1773_s14 }
  0x12   :  { %p1780_p8 = por %p1779_p7, %p1778_p6 }
  0x14   :  { %p1781_p9 = pnand %p1780_p8, %p1774_p5 }
  0x16   :  { %1784 = shalt.err (!%p1781_p9)
}
  0x17   :  { %30 = dma.hbm_to_vmem [thread:$0]  %s2227_s1, 256, %s25_s30, [#allocation3], %s1855_s10, %s1855_s10, %s1856_s11  }
  0x18   :  { %s1857_s17 = smov [#allocation7]  }
  0x19   :  { %s52_s18 = sshll.u32 %s1857_s17, 4  ;;  %s53_s18 = int_to_ptr.vmem [resolvable:$true] %s52_s18 }
  0x1a   :  { %s1793_s19 = scalar_lea.vmem %s53_s18, 256  ;;  %p1798_p11 = scmp.lt.s32.totalorder %s53_s18, %s53_s18 }
  0x1b   :  { %p1794_p10 = scmp.ne.s32.totalorder %s53_s18, %s1793_s19  ;;  %p1799_p12 = scmp.lt.s32.totalorder %s1793_s19, %s1793_s19 }
  0x1d   :  { %p1800_p13 = por %p1799_p12, %p1798_p11 }
  0x1f   :  { %p1801_p0 = pnand %p1800_p13, %p1794_p10 }
  0x21   :  { %1804 = shalt.err (!%p1801_p0)
}
  0x22   :  { %s1858_s4 = smov 64   ;;  %s1859_s20 = smov 4  }
  0x23   :  { %58 = dma.hbm_to_vmem [thread:$0]  %s2231_s5, 256, %s53_s18, [#allocation6], %s1858_s4, %s1858_s4, %s1859_s20  }
  0x24   :  { %s1860_s23 = smov [#allocation8]  }
  0x25   :  { %s64_s1 = sshll.u32 %s1860_s23, 4  ;;  %s65_s1 = int_to_ptr.vmem [resolvable:$true] %s64_s1 }
  0x26   :  { %s1813_s24 = scalar_lea.vmem %s65_s1, 256  ;;  %p1818_p2 = scmp.lt.s32.totalorder %s65_s1, %s65_s1 }
  0x27   :  { %p1814_p1 = scmp.ne.s32.totalorder %s65_s1, %s1813_s24  ;;  %p1819_p3 = scmp.lt.s32.totalorder %s1813_s24, %s1813_s24 }
  0x29   :  { %p1820_p4 = por %p1819_p3, %p1818_p2 }
  0x2b   :  { %p1821_p5 = pnand %p1820_p4, %p1814_p1 }
  0x2d   :  { %1824 = shalt.err (!%p1821_p5)
}
  0x2e   :  { %70 = dma.hbm_to_vmem [thread:$0]  %s2232_s6, 256, %s65_s1, [#allocation9], %s1858_s4, %s1858_s4, %s1859_s20  }
  0x2f   :  { %1845 = dma.done.wait [#allocation3], 256  }
  0x30   :  { %1846 = vsyncadd [#allocation3], 4294967040 }
  0x31   :  { %1847 = dma.done.wait [#allocation6], 768  }
  0x32   :  { %1848 = vsyncadd [#allocation6], 4294966528 }
  0x33   :  { %1849 = dma.done.wait [#allocation9], 256  }
  0x34   :  { %1850 = vsyncadd [#allocation9], 4294967040  ;;  %v1945_v0 = vld [vmem:[%s2226_s0] sm:$0xff]  ;;  %vm97_vm0 = vcmask 261120   ;;  %v1950_v1 = vld [vmem:[%s2226_s0 + $0x8] sm:$0xff]  ;;  %v1861_v9 = vmov 0   ;;  %v113_v11 = vlaneseq }
  0x35   :  { %v95_v2 = vmul.f32 %v1945_v0, %v1945_v0  ;;  %v96_v3 = vmul.f32 %v1950_v1, %v1950_v1  ;;  %v1683_v6 = vld [vmem:[#allocation5 + $0x14] ss:$8 sps:$4 sm:$0xff]   ;;  %v1685_v7 = vld [vmem:[#allocation5 + $0x10] ss:$8 sps:$4 sm:$0xff]   ;;  %v1686_v8 = vld [vmem:[#allocation5 + $0x4] ss:$8 sps:$4 sm:$0xff]   ;;  %179 = vmatprep.mubr.bf16.mxu0 %v1861_v9 }
  0x36   :  { %159 = vmatprep.subr.bf16.mxu0 %v1683_v6  ;;  %v1688_v10 = vld [vmem:[#allocation5] ss:$8 sps:$4 sm:$0xff]   ;;  %v114_v12 = vshrl.u32 %v113_v11, 7  ;;  %v1964_v15 = vld [vmem:[%s2228_s2] sm:$0xff]  ;;  %s1862_s14 = smov 96   ;;  %v1981_v19 = vld [vmem:[%s2228_s2 + $0x8] sm:$0xff] }
  0x37   :  { %v98_v4 = vsel %vm97_vm0, %v95_v2, 0.0  ;;  %v101_v5 = vsel %vm97_vm0, %v96_v3, 0.0  ;;  %160 = vmatpush1.bf16.msra.mxu0 %v1685_v7  ;;  %v92_v14 = vld [vmem:[%s2228_s2 + $0x10] sm:$0xff]  ;;  %v94_v16 = vld [vmem:[%s2229_s3] sm:$0x3]  ;;  %v93_v18 = vld [vmem:[%s2228_s2 + $0x18] sm:$0xff] }
  0x38   :  { %99 = vadd.xlane.f32.xlu0 %v98_v4  ;;  %161 = vmatprep.subr.bf16.mxu0 %v1686_v8  ;;  %v1255_v13 = vsub.s32 1, %v114_v12  ;;  %v115_v26 = vsub.s32 0, %v114_v12  ;;  %s1863_s2 = smov 32   ;;  %v1864_v42 = vmov 0.0   ;;  %vm1865_vm1 = vmmov 0   ;;  %s1866_s3 = smov 56  }
  0x39   :  { %222 = vrot.lane.b32.xlu1 %v92_v14, %s1862_s14  ;;  %1522 = vmatprep.subr.bf16.mxu1 %v1864_v42  ;;  %vm249_vm2 = vcmask 64512   ;;  %vm376_vm3 = vcmask 1043456   ;;  %s1867_s19 = smov 120   ;;  %s1868_s20 = smov 48   ;;  %vm1168_vm4 = vcmask 130048   ;;  %vm1171_vm5 = vcmask 195584  }
  0x3a   :  { %v1972_v17 = vrot.slane %v94_v16, %v1255_v13  ;;  %v116_v29 = vrot.slane %v94_v16, %v115_v26  ;;  %1524 = vmatprep.mubr.msk.bf16.mxu1 %vm1865_vm1, %v1864_v42  ;;  %v2034_v13 = vld [vmem:[#allocation2] sm:$0xff]  ;;  %s1869_s21 = smov 112   ;;  %s1870_s22 = smov 40   ;;  %vm1377_vm6 = vcmask 523264  }
  0x3b   :  { %162 = vmatpush1.bf16.msra.mxu0 %v1688_v10  ;;  %s1871_s23 = smov 104   ;;  %s1872_s1 = smov 16  }
  0x3c   :  { %102 = vadd.xlane.f32.xlu0 %v101_v5  ;;  %1528 = vmatprep.subr.bf16.mxu0 %v1864_v42  ;;  %s1873_s24 = smov 24  }
  0x3d   :  { %224 = vrot.lane.b32.xlu1 %v93_v18, %s1862_s14 }
  0x41   :  { %216 = vrot.lane.b32.xlu1 %v1981_v19, %s1858_s4 }
  0x52   :  { %214 = vrot.lane.b32.xlu0 %v1964_v15, %s1858_s4 }
  0xab   :  { %v223_v35 = vpop.permute.xlu1 %222 }
  0xaf   :  { %v225_v39 = vpop.permute.xlu1 %224 }
  0xb3   :  { %v217_v44 = vpop.permute.xlu1 %216 }
  0xc1   :  { %v100_v20 = vpop.xlane.xlu0 %99 }
  0xc2   :  { %v105_v21 = vmul.f32 0.03125, %v100_v20  ;;  %v2037_v20 = vld [vmem:[#allocation2 + $0x8] sm:$0xff] }
  0xc4   :  { %v107_v22 = vadd.f32 1e-06, %v105_v21 }
  0xc5   :  { %v103_v23 = vpop.xlane.xlu0 %102 }
  0xc6   :  { %1697 = vrsqrt.f32 %v107_v22  ;;  %v106_v24 = vmul.f32 0.03125, %v103_v23 }
  0xc8   :  { %v108_v25 = vadd.f32 1e-06, %v106_v24 }
  0xc9   :  { %v215_v43 = vpop.permute.xlu0 %214 }
  0xca   :  { %1699 = vrsqrt.f32 %v108_v25 }
  0xd3   :  { %v1698_v27 = vpop.eup %1697 }
  0xd4   :  { %v111_v28 = vmul.f32 %v1698_v27, %v1945_v0 }
  0xd6   :  { %v117_v32 = vmul.f32 %v116_v29, %v111_v28 }
  0xd7   :  { %v1700_v30 = vpop.eup %1699 }
  0xd8   :  { %v112_v31 = vmul.f32 %v1700_v30, %v1950_v1 }
  0xda   :  { %v118_v33 = vmul.f32 %v116_v29, %v112_v31 }
  0xdc   :  { %v123_v34 = vpack.c.bf16 %v118_v33, %v117_v32 }
  0xde   :  { %1449 = vmatmul.mubr.msk.bf16.vlgmr.msra.gmra.mxu0 %vm97_vm0, %v123_v34 }
  0xdf   :  { %1530 = vmatprep.mubr.msk.bf16.mxu0 %vm1865_vm1, %v1864_v42 }
 0x19e   :  { %v181_v36 = vpop.f32.mrf.mxu0 }
 0x19f   :  { %v228_v37 = vmul.f32 %v223_v35, %v181_v36  ;;  %v220_v45 = vmul.f32 %v215_v43, %v181_v36  ;;  %v190_v61 = vmul.f32 %v181_v36, %v1964_v15 }
 0x1a0   :  { %v183_v38 = vpop.f32.mrf.mxu0 }
 0x1a1   :  { %232 = vrot.lane.b32.xlu1 %v228_v37, %s1862_s14  ;;  %v2010_v63 = vpack.c.bf16 %v183_v38, %v183_v38 }
 0x1a2   :  { %v185_v40 = vpop.f32.mrf.mxu0 }
 0x1a3   :  { %v229_v41 = vmul.f32 %v225_v39, %v185_v40  ;;  %v221_v49 = vmul.f32 %v217_v44, %v185_v40  ;;  %v191_v5 = vmul.f32 %v185_v40, %v1981_v19  ;;  %v378_v9 = vsel %vm376_vm3, %v2010_v63, 0 }
 0x1a4   :  { %v187_v3 = vpop.f32.mrf.mxu0 }
 0x1a5   :  { %234 = vrot.lane.b32.xlu1 %v229_v41, %s1862_s14  ;;  %v2016_v7 = vpack.c.bf16 %v187_v3, %v187_v3 }
 0x1a7   :  { %v424_v11 = vsel %vm376_vm3, %v2016_v7, 0 }
 0x1a9   :  { %194 = vrot.lane.b32.xlu1 %v92_v14, %s1863_s2 }
 0x1ad   :  { %196 = vrot.lane.b32.xlu1 %v93_v18, %s1863_s2 }
 0x213   :  { %v233_v46 = vpop.permute.xlu1 %232 }
 0x214   :  { %v238_v47 = vadd.f32 %v233_v46, %v220_v45 }
 0x216   :  { %v1996_v48 = vpack.c.bf16 %v238_v47, %v238_v47 }
 0x217   :  { %v235_v50 = vpop.permute.xlu1 %234 }
 0x218   :  { %v239_v51 = vadd.f32 %v235_v50, %v221_v49  ;;  %247 = vrot.lane.b32.xlu1 %v1996_v48, %s1858_s4 }
 0x21a   :  { %v2000_v52 = vpack.c.bf16 %v239_v51, %v239_v51 }
 0x21b   :  { %v195_v53 = vpop.permute.xlu1 %194 }
 0x21c   :  { %v200_v54 = vmul.f32 %v195_v53, %v181_v36  ;;  %297 = vrot.lane.b32.xlu0 %v2000_v52, %s1858_s4 }
 0x21e   :  { %204 = vrot.lane.b32.xlu1 %v200_v54, %s1862_s14 }
 0x21f   :  { %v197_v55 = vpop.permute.xlu1 %196 }
 0x220   :  { %v201_v56 = vmul.f32 %v197_v55, %v185_v40 }
 0x222   :  { %206 = vrot.lane.b32.xlu0 %v201_v56, %s1862_s14 }
 0x28a   :  { %v248_v57 = vpop.permute.xlu1 %247 }
 0x28b   :  { %v254_v58 = vsel %vm249_vm2, %v248_v57, 0 }
 0x28c   :  { %1523 = vmatpush3.bf16.xpose.msra.mxu1 %v254_v58 }
 0x28d   :  { %1534 = vmatprep.subr.bf16.mxu1 %v1864_v42 }
 0x28e   :  { %v298_v59 = vpop.permute.xlu0 %297 }
 0x28f   :  { %v303_v60 = vsel %vm249_vm2, %v298_v59, 0 }
 0x290   :  { %v205_v62 = vpop.permute.xlu1 %204  ;;  %1529 = vmatpush3.bf16.xpose.msra.mxu0 %v303_v60 }
 0x291   :  { %v210_v2 = vadd.f32 %v205_v62, %v190_v61  ;;  %1540 = vmatprep.subr.bf16.mxu0 %v1864_v42 }
 0x293   :  { %v2013_v4 = vpack.c.bf16 %v210_v2, %v210_v2 }
 0x294   :  { %v207_v6 = vpop.permute.xlu0 %206 }
 0x295   :  { %v211_v8 = vadd.f32 %v207_v6, %v191_v5  ;;  %1525 = vmatmul.mubr.msk.bf16.vlgmr.msra.gmra.mxu1 %vm249_vm2, %v2013_v4 }
 0x296   :  { %1535 = vmatpush3.bf16.msra.mxu1 %v378_v9  ;;  %1536 = vmatprep.mubr.msk.bf16.mxu1 %vm1865_vm1, %v1864_v42 }
 0x297   :  { %v2024_v10 = vpack.c.bf16 %v211_v8, %v211_v8  ;;  %1546 = vmatprep.subr.bf16.mxu1 %v1864_v42 }
 0x299   :  { %1531 = vmatmul.mubr.msk.bf16.vlgmr.msra.gmra.mxu0 %vm249_vm2, %v2024_v10 }
 0x29a   :  { %1541 = vmatpush3.bf16.msra.mxu0 %v424_v11  ;;  %1542 = vmatprep.mubr.msk.bf16.mxu0 %vm1865_vm1, %v1864_v42 }
 0x29b   :  { %1552 = vmatprep.subr.bf16.mxu0 %v1864_v42 }
 0x355   :  { %v290_v12 = vpop.f32.mrf.mxu1 }
 0x356   :  { %v345_v14 = vmul.f32 0.35355338, %v290_v12 }
 0x357   :  { %v1526_v15 = vpop.f32.mrf.mxu1 }
 0x358   :  { %v347_v16 = vadd.f32 %v345_v14, %v2034_v13 }
 0x359   :  { %v293_v18 = vpop.f32.mrf.mxu1  ;;  %v339_v19 = vpop.f32.mrf.mxu0 }
 0x35a   :  { %v346_v21 = vmul.f32 0.35355338, %v339_v19  ;;  %v349_v22 = vsel %vm249_vm2, %v347_v16, -inf }
 0x35b   :  { %350 = vmax.xlane.f32.xlu1 %v349_v22  ;;  %v1527_v23 = vpop.f32.mrf.mxu1  ;;  %v1532_v24 = vpop.f32.mrf.mxu0 }
 0x35c   :  { %v348_v25 = vadd.f32 %v346_v21, %v2037_v20 }
 0x35d   :  { %v342_v26 = vpop.f32.mrf.mxu0 }
 0x35e   :  { %v352_v27 = vsel %vm249_vm2, %v348_v25, -inf }
 0x35f   :  { %353 = vmax.xlane.f32.xlu0 %v352_v27  ;;  %v1533_v28 = vpop.f32.mrf.mxu0 }
 0x3e4   :  { %v351_v29 = vpop.xlane.xlu1 %350 }
 0x3e5   :  { %v355_v30 = vsub.f32 %v347_v16, %v351_v29 }
 0x3e7   :  { %v357_v31 = vmul.f32 1.442695, %v355_v30 }
 0x3e8   :  { %v354_v32 = vpop.xlane.xlu0 %353 }
 0x3e9   :  { %1701 = vpow2.f32 %v357_v31  ;;  %v356_v33 = vsub.f32 %v348_v25, %v354_v32 }
 0x3eb   :  { %v359_v34 = vmul.f32 1.442695, %v356_v33 }
 0x3ed   :  { %1703 = vpow2.f32 %v359_v34 }
 0x3f6   :  { %v1702_v35 = vpop.eup %1701 }
 0x3f7   :  { %v361_v36 = vsel %vm249_vm2, %v1702_v35, 0.0 }
 0x3f8   :  { %362 = vadd.xlane.f32.xlu0 %v361_v36 }
 0x3fa   :  { %v1704_v37 = vpop.eup %1703 }
 0x3fb   :  { %v364_v38 = vsel %vm249_vm2, %v1704_v37, 0.0 }
 0x3fc   :  { %365 = vadd.xlane.f32.xlu1 %v364_v38 }
 0x40d   :  { %520 = vrot.lane.b32.xlu1 %v2000_v52, %s1866_s3 }
 0x40e   :  { %469 = vrot.lane.b32.xlu0 %v1996_v48, %s1866_s3 }
 0x411   :  { %467 = vrot.lane.b32.xlu1 %v2013_v4, %s1867_s19 }
 0x412   :  { %518 = vrot.lane.b32.xlu0 %v2024_v10, %s1867_s19 }
 0x481   :  { %v363_v39 = vpop.xlane.xlu0 %362 }
 0x482   :  { %1705 = vrcp.f32 %v363_v39 }
 0x485   :  { %v366_v40 = vpop.xlane.xlu1 %365  ;;  %v470_v44 = vpop.permute.xlu0 %469 }
 0x486   :  { %1707 = vrcp.f32 %v366_v40  ;;  %v475_v47 = vsel %vm249_vm2, %v470_v44, 0 }
 0x489   :  { %v521_v50 = vpop.permute.xlu1 %520  ;;  %v519_v55 = vpop.permute.xlu0 %518 }
 0x48a   :  { %v526_v53 = vsel %vm249_vm2, %v521_v50, 0 }
 0x48d   :  { %v468_v54 = vpop.permute.xlu1 %467 }
 0x48f   :  { %v1706_v41 = vpop.eup %1705 }
 0x490   :  { %v368_v43 = vmul.f32 %v1706_v41, %v1702_v35 }
 0x492   :  { %v371_v45 = vpack.c.bf16 %v368_v43, %v368_v43 }
 0x493   :  { %v1708_v46 = vpop.eup %1707 }
 0x494   :  { %1537 = vmatmul.mubr.msk.bf16.vlgmr.msra.gmra.mxu1 %vm249_vm2, %v371_v45  ;;  %v370_v49 = vmul.f32 %v1708_v46, %v1704_v37 }
 0x495   :  { %1547 = vmatpush3.bf16.xpose.msra.mxu1 %v475_v47  ;;  %1548 = vmatprep.mubr.msk.bf16.mxu1 %vm1865_vm1, %v1864_v42 }
 0x496   :  { %v372_v51 = vpack.c.bf16 %v370_v49, %v370_v49  ;;  %1558 = vmatprep.subr.bf16.mxu1 %v1864_v42 }
 0x498   :  { %1543 = vmatmul.mubr.msk.bf16.vlgmr.msra.gmra.mxu0 %vm249_vm2, %v372_v51 }
 0x499   :  { %1553 = vmatpush3.bf16.xpose.msra.mxu0 %v526_v53  ;;  %1554 = vmatprep.mubr.msk.bf16.mxu0 %vm1865_vm1, %v1864_v42 }
 0x49a   :  { %1564 = vmatprep.subr.bf16.mxu0 %v1864_v42 }
 0x49c   :  { %1549 = vmatmul.mubr.msk.bf16.vlgmr.msra.gmra.mxu1 %vm249_vm2, %v468_v54 }
 0x49d   :  { %1560 = vmatprep.mubr.msk.bf16.mxu1 %vm1865_vm1, %v1864_v42 }
 0x4a0   :  { %1555 = vmatmul.mubr.msk.bf16.vlgmr.msra.gmra.mxu0 %vm249_vm2, %v519_v55 }
 0x4a1   :  { %1566 = vmatprep.mubr.msk.bf16.mxu0 %vm1865_vm1, %v1864_v42 }
 0x554   :  { %v2066_v56 = vpop.f32.mrf.mxu1 }
 0x556   :  { %v1538_v57 = vpop.f32.mrf.mxu1 }
 0x558   :  { %v417_v58 = vpop.f32.mrf.mxu1  ;;  %v2068_v59 = vpop.f32.mrf.mxu0 }
 0x55a   :  { %v1539_v60 = vpop.f32.mrf.mxu1  ;;  %v1544_v61 = vpop.f32.mrf.mxu0 }
 0x55c   :  { %v463_v62 = vpop.f32.mrf.mxu0  ;;  %v511_v2 = vpop.f32.mrf.mxu1 }
 0x55d   :  { %v568_v3 = vmul.f32 0.35355338, %v511_v2 }
 0x55e   :  { %v1545_v5 = vpop.f32.mrf.mxu0  ;;  %v1550_v6 = vpop.f32.mrf.mxu1 }
 0x55f   :  { %v570_v8 = vadd.f32 %v568_v3, %v2034_v13 }
 0x560   :  { %v514_v9 = vpop.f32.mrf.mxu1  ;;  %v562_v11 = vpop.f32.mrf.mxu0 }
 0x561   :  { %v569_v12 = vmul.f32 0.35355338, %v562_v11  ;;  %v572_v14 = vsel %vm249_vm2, %v570_v8, -inf }
 0x562   :  { %573 = vmax.xlane.f32.xlu1 %v572_v14  ;;  %v1551_v15 = vpop.f32.mrf.mxu1  ;;  %v1556_v16 = vpop.f32.mrf.mxu0 }
 0x563   :  { %v571_v18 = vadd.f32 %v569_v12, %v2037_v20 }
 0x564   :  { %v565_v19 = vpop.f32.mrf.mxu0 }
 0x565   :  { %v575_v21 = vsel %vm249_vm2, %v571_v18, -inf }
 0x566   :  { %576 = vmax.xlane.f32.xlu0 %v575_v21  ;;  %v1557_v22 = vpop.f32.mrf.mxu0 }
 0x573   :  { %646 = vrot.lane.b32.xlu1 %v2016_v7, %s1867_s19 }
 0x57c   :  { %597 = vrot.lane.b32.xlu0 %v2010_v63, %s1867_s19 }
 0x5eb   :  { %v574_v23 = vpop.xlane.xlu1 %573 }
 0x5ec   :  { %v578_v24 = vsub.f32 %v570_v8, %v574_v23 }
 0x5ee   :  { %v580_v25 = vmul.f32 1.442695, %v578_v24 }
 0x5ef   :  { %v647_v26 = vpop.permute.xlu1 %646  ;;  %v577_v27 = vpop.xlane.xlu0 %576 }
 0x5f0   :  { %1709 = vpow2.f32 %v580_v25  ;;  %v652_v28 = vsel %vm376_vm3, %v647_v26, 0  ;;  %v579_v29 = vsub.f32 %v571_v18, %v577_v27 }
 0x5f1   :  { %1565 = vmatpush3.bf16.msra.mxu0 %v652_v28 }
 0x5f2   :  { %v582_v30 = vmul.f32 1.442695, %v579_v29  ;;  %1576 = vmatprep.subr.bf16.mxu0 %v1864_v42 }
 0x5f3   :  { %v598_v31 = vpop.permute.xlu0 %597 }
 0x5f4   :  { %1711 = vpow2.f32 %v582_v30  ;;  %v603_v32 = vsel %vm376_vm3, %v598_v31, 0 }
 0x5f5   :  { %1559 = vmatpush3.bf16.msra.mxu1 %v603_v32 }
 0x5f6   :  { %1570 = vmatprep.subr.bf16.mxu1 %v1864_v42 }
 0x5fd   :  { %v1710_v33 = vpop.eup %1709 }
 0x5fe   :  { %v584_v34 = vsel %vm249_vm2, %v1710_v33, 0.0 }
 0x5ff   :  { %585 = vadd.xlane.f32.xlu0 %v584_v34 }
 0x601   :  { %v1712_v35 = vpop.eup %1711 }
 0x602   :  { %v587_v36 = vsel %vm249_vm2, %v1712_v35, 0.0 }
 0x603   :  { %588 = vadd.xlane.f32.xlu1 %v587_v36 }
 0x614   :  { %696 = vrot.lane.b32.xlu1 %v1996_v48, %s1868_s20 }
 0x615   :  { %746 = vrot.lane.b32.xlu0 %v2000_v52, %s1868_s20 }
 0x618   :  { %694 = vrot.lane.b32.xlu1 %v2013_v4, %s1869_s21 }
 0x619   :  { %744 = vrot.lane.b32.xlu0 %v2024_v10, %s1869_s21 }
 0x688   :  { %v586_v37 = vpop.xlane.xlu0 %585 }
 0x689   :  { %1713 = vrcp.f32 %v586_v37 }
 0x68c   :  { %v589_v38 = vpop.xlane.xlu1 %588  ;;  %v747_v47 = vpop.permute.xlu0 %746 }
 0x68d   :  { %1715 = vrcp.f32 %v589_v38  ;;  %v752_v50 = vsel %vm249_vm2, %v747_v47, 0 }
 0x690   :  { %v697_v41 = vpop.permute.xlu1 %696  ;;  %v745_v53 = vpop.permute.xlu0 %744 }
 0x691   :  { %v702_v45 = vsel %vm249_vm2, %v697_v41, 0 }
 0x694   :  { %v695_v51 = vpop.permute.xlu1 %694 }
 0x696   :  { %v1714_v39 = vpop.eup %1713 }
 0x697   :  { %v591_v40 = vmul.f32 %v1714_v39, %v1710_v33 }
 0x699   :  { %v594_v43 = vpack.c.bf16 %v591_v40, %v591_v40 }
 0x69a   :  { %v1716_v44 = vpop.eup %1715 }
 0x69b   :  { %1561 = vmatmul.mubr.msk.bf16.vlgmr.msra.gmra.mxu1 %vm249_vm2, %v594_v43  ;;  %v593_v46 = vmul.f32 %v1716_v44, %v1712_v35 }
 0x69c   :  { %1571 = vmatpush3.bf16.xpose.msra.mxu1 %v702_v45  ;;  %1572 = vmatprep.mubr.msk.bf16.mxu1 %vm1865_vm1, %v1864_v42 }
 0x69d   :  { %v595_v49 = vpack.c.bf16 %v593_v46, %v593_v46  ;;  %1582 = vmatprep.subr.bf16.mxu1 %v1864_v42 }
 0x69f   :  { %1567 = vmatmul.mubr.msk.bf16.vlgmr.msra.gmra.mxu0 %vm249_vm2, %v595_v49 }
 0x6a0   :  { %1577 = vmatpush3.bf16.xpose.msra.mxu0 %v752_v50  ;;  %1578 = vmatprep.mubr.msk.bf16.mxu0 %vm1865_vm1, %v1864_v42 }
 0x6a1   :  { %1588 = vmatprep.subr.bf16.mxu0 %v1864_v42 }
 0x6a3   :  { %1573 = vmatmul.mubr.msk.bf16.vlgmr.msra.gmra.mxu1 %vm249_vm2, %v695_v51 }
 0x6a4   :  { %1584 = vmatprep.mubr.msk.bf16.mxu1 %vm1865_vm1, %v1864_v42 }
 0x6a7   :  { %1579 = vmatmul.mubr.msk.bf16.vlgmr.msra.gmra.mxu0 %vm249_vm2, %v745_v53 }
 0x6a8   :  { %1590 = vmatprep.mubr.msk.bf16.mxu0 %vm1865_vm1, %v1864_v42 }
 0x75b   :  { %v2106_v54 = vpop.f32.mrf.mxu1 }
 0x75d   :  { %v1562_v55 = vpop.f32.mrf.mxu1 }
 0x75f   :  { %v642_v57 = vpop.f32.mrf.mxu1  ;;  %v2108_v58 = vpop.f32.mrf.mxu0 }
 0x760   :  { %v1668_v60 = vpack.i.bf16 %v2108_v58, %v2106_v54 }
 0x761   :  { %v1563_v61 = vpop.f32.mrf.mxu1  ;;  %v1568_v62 = vpop.f32.mrf.mxu0 }
 0x763   :  { %v691_v2 = vpop.f32.mrf.mxu0  ;;  %v738_v3 = vpop.f32.mrf.mxu1 }
 0x764   :  { %v794_v5 = vmul.f32 0.35355338, %v738_v3 }
 0x765   :  { %v1569_v6 = vpop.f32.mrf.mxu0  ;;  %v1574_v8 = vpop.f32.mrf.mxu1 }
 0x766   :  { %v796_v9 = vadd.f32 %v794_v5, %v2034_v13 }
 0x767   :  { %v741_v11 = vpop.f32.mrf.mxu1  ;;  %v788_v12 = vpop.f32.mrf.mxu0 }
 0x768   :  { %v795_v14 = vmul.f32 0.35355338, %v788_v12  ;;  %v798_v15 = vsel %vm249_vm2, %v796_v9, -inf }
 0x769   :  { %799 = vmax.xlane.f32.xlu1 %v798_v15  ;;  %v1575_v16 = vpop.f32.mrf.mxu1  ;;  %v1580_v18 = vpop.f32.mrf.mxu0 }
 0x76a   :  { %v797_v19 = vadd.f32 %v795_v14, %v2037_v20 }
 0x76b   :  { %v791_v21 = vpop.f32.mrf.mxu0 }
 0x76c   :  { %v801_v22 = vsel %vm249_vm2, %v797_v19, -inf }
 0x76d   :  { %802 = vmax.xlane.f32.xlu0 %v801_v22  ;;  %v1581_v23 = vpop.f32.mrf.mxu0 }
 0x77a   :  { %870 = vrot.lane.b32.xlu1 %v2016_v7, %s1869_s21 }
 0x783   :  { %822 = vrot.lane.b32.xlu0 %v2010_v63, %s1869_s21 }
 0x7f2   :  { %v800_v24 = vpop.xlane.xlu1 %799 }
 0x7f3   :  { %v804_v25 = vsub.f32 %v796_v9, %v800_v24 }
 0x7f5   :  { %v806_v26 = vmul.f32 1.442695, %v804_v25 }
 0x7f6   :  { %v871_v27 = vpop.permute.xlu1 %870  ;;  %v803_v28 = vpop.xlane.xlu0 %802 }
 0x7f7   :  { %1717 = vpow2.f32 %v806_v26  ;;  %v876_v29 = vsel %vm376_vm3, %v871_v27, 0  ;;  %v805_v30 = vsub.f32 %v797_v19, %v803_v28 }
 0x7f8   :  { %1589 = vmatpush3.bf16.msra.mxu0 %v876_v29 }
 0x7f9   :  { %v808_v31 = vmul.f32 1.442695, %v805_v30  ;;  %1600 = vmatprep.subr.bf16.mxu0 %v1864_v42 }
 0x7fa   :  { %v823_v32 = vpop.permute.xlu0 %822 }
 0x7fb   :  { %1719 = vpow2.f32 %v808_v31  ;;  %v828_v33 = vsel %vm376_vm3, %v823_v32, 0 }
 0x7fc   :  { %1583 = vmatpush3.bf16.msra.mxu1 %v828_v33 }
 0x7fd   :  { %1594 = vmatprep.subr.bf16.mxu1 %v1864_v42 }
 0x804   :  { %v1718_v34 = vpop.eup %1717 }
 0x805   :  { %v810_v35 = vsel %vm249_vm2, %v1718_v34, 0.0 }
 0x806   :  { %811 = vadd.xlane.f32.xlu0 %v810_v35 }
 0x808   :  { %v1720_v36 = vpop.eup %1719 }
 0x809   :  { %v813_v37 = vsel %vm249_vm2, %v1720_v36, 0.0 }
 0x80a   :  { %814 = vadd.xlane.f32.xlu1 %v813_v37 }
 0x81b   :  { %920 = vrot.lane.b32.xlu1 %v1996_v48, %s1870_s22 }
 0x81c   :  { %970 = vrot.lane.b32.xlu0 %v2000_v52, %s1870_s22 }
 0x81f   :  { %918 = vrot.lane.b32.xlu1 %v2013_v4, %s1871_s23 }
 0x820   :  { %968 = vrot.lane.b32.xlu0 %v2024_v10, %s1871_s23 }
 0x88f   :  { %v812_v38 = vpop.xlane.xlu0 %811 }
 0x890   :  { %1721 = vrcp.f32 %v812_v38 }
 0x893   :  { %v815_v39 = vpop.xlane.xlu1 %814  ;;  %v971_v46 = vpop.permute.xlu0 %970 }
 0x894   :  { %1723 = vrcp.f32 %v815_v39  ;;  %v976_v10 = vsel %vm249_vm2, %v971_v46, 0  ;;  %v1689_v39 = vld [vmem:[#allocation7 + $0x8] sm:$0xff]  }
 0x897   :  { %v921_v43 = vpop.permute.xlu1 %920  ;;  %v969_v49 = vpop.permute.xlu0 %968 }
 0x898   :  { %v926_v48 = vsel %vm249_vm2, %v921_v43, 0 }
 0x89b   :  { %v919_v47 = vpop.permute.xlu1 %918 }
 0x89d   :  { %v1722_v40 = vpop.eup %1721 }
 0x89e   :  { %v817_v41 = vmul.f32 %v1722_v40, %v1718_v34  ;;  %v1690_v40 = vld [vmem:[#allocation7] sm:$0xff]  }
 0x8a0   :  { %v820_v44 = vpack.c.bf16 %v817_v41, %v817_v41 }
 0x8a1   :  { %v1724_v45 = vpop.eup %1723 }
 0x8a2   :  { %1585 = vmatmul.mubr.msk.bf16.vlgmr.msra.gmra.mxu1 %vm249_vm2, %v820_v44  ;;  %v819_v52 = vmul.f32 %v1724_v45, %v1720_v36 }
 0x8a3   :  { %1595 = vmatpush3.bf16.xpose.msra.mxu1 %v926_v48  ;;  %1596 = vmatprep.mubr.msk.bf16.mxu1 %vm1865_vm1, %v1864_v42 }
 0x8a4   :  { %v821_v4 = vpack.c.bf16 %v819_v52, %v819_v52  ;;  %1606 = vmatprep.subr.bf16.mxu1 %v1864_v42 }
 0x8a6   :  { %1591 = vmatmul.mubr.msk.bf16.vlgmr.msra.gmra.mxu0 %vm249_vm2, %v821_v4 }
 0x8a7   :  { %1601 = vmatpush3.bf16.xpose.msra.mxu0 %v976_v10  ;;  %1602 = vmatprep.mubr.msk.bf16.mxu0 %vm1865_vm1, %v1864_v42 }
 0x8a8   :  { %1612 = vmatprep.subr.bf16.mxu0 %v1864_v42 }
 0x8aa   :  { %1597 = vmatmul.mubr.msk.bf16.vlgmr.msra.gmra.mxu1 %vm249_vm2, %v919_v47 }
 0x8ab   :  { %1608 = vmatprep.mubr.msk.bf16.mxu1 %vm1865_vm1, %v1864_v42 }
 0x8ae   :  { %1603 = vmatmul.mubr.msk.bf16.vlgmr.msra.gmra.mxu0 %vm249_vm2, %v969_v49 }
 0x8af   :  { %1614 = vmatprep.mubr.msk.bf16.mxu0 %vm1865_vm1, %v1864_v42 }
 0x962   :  { %v864_v50 = vpop.f32.mrf.mxu1 }
 0x964   :  { %v1586_v51 = vpop.f32.mrf.mxu1 }
 0x966   :  { %v867_v53 = vpop.f32.mrf.mxu1  ;;  %v912_v55 = vpop.f32.mrf.mxu0 }
 0x967   :  { %v1673_v57 = vpack.i.bf16 %v912_v55, %v864_v50 }
 0x968   :  { %v1587_v61 = vpop.f32.mrf.mxu1  ;;  %v1592_v62 = vpop.f32.mrf.mxu0 }
 0x96a   :  { %v915_v2 = vpop.f32.mrf.mxu0  ;;  %v962_v3 = vpop.f32.mrf.mxu1 }
 0x96b   :  { %v1018_v5 = vmul.f32 0.35355338, %v962_v3 }
 0x96c   :  { %v1593_v6 = vpop.f32.mrf.mxu0  ;;  %v1598_v8 = vpop.f32.mrf.mxu1 }
 0x96d   :  { %v1020_v9 = vadd.f32 %v1018_v5, %v2034_v13 }
 0x96e   :  { %v965_v11 = vpop.f32.mrf.mxu1  ;;  %v1012_v12 = vpop.f32.mrf.mxu0 }
 0x96f   :  { %v1019_v14 = vmul.f32 0.35355338, %v1012_v12  ;;  %v1022_v15 = vsel %vm249_vm2, %v1020_v9, -inf }
 0x970   :  { %1023 = vmax.xlane.f32.xlu1 %v1022_v15  ;;  %v1599_v16 = vpop.f32.mrf.mxu1  ;;  %v1604_v18 = vpop.f32.mrf.mxu0 }
 0x971   :  { %v1021_v19 = vadd.f32 %v1019_v14, %v2037_v20 }
 0x972   :  { %v1015_v21 = vpop.f32.mrf.mxu0 }
 0x973   :  { %v1025_v22 = vsel %vm249_vm2, %v1021_v19, -inf }
 0x974   :  { %1026 = vmax.xlane.f32.xlu0 %v1025_v22  ;;  %v1605_v23 = vpop.f32.mrf.mxu0 }
 0x975   :  { %v1692_v23 = vld [vmem:[#allocation8] sm:$0xff]  }
 0x9f9   :  { %v1024_v24 = vpop.xlane.xlu1 %1023 }
 0x9fa   :  { %v1028_v25 = vsub.f32 %v1020_v9, %v1024_v24 }
 0x9fc   :  { %v1030_v26 = vmul.f32 1.442695, %v1028_v25 }
 0x9fd   :  { %v1027_v27 = vpop.xlane.xlu0 %1026 }
 0x9fe   :  { %1725 = vpow2.f32 %v1030_v26  ;;  %v1029_v13 = vsub.f32 %v1021_v19, %v1027_v27 }
 0xa00   :  { %v1032_v28 = vmul.f32 1.442695, %v1029_v13 }
 0xa02   :  { %1727 = vpow2.f32 %v1032_v28 }
 0xa0b   :  { %v1726_v29 = vpop.eup %1725 }
 0xa0c   :  { %v1034_v30 = vsel %vm249_vm2, %v1726_v29, 0.0 }
 0xa0d   :  { %1035 = vadd.xlane.f32.xlu0 %v1034_v30 }
 0xa0f   :  { %v1728_v31 = vpop.eup %1727 }
 0xa10   :  { %v1037_v20 = vsel %vm249_vm2, %v1728_v31, 0.0 }
 0xa11   :  { %1038 = vadd.xlane.f32.xlu1 %v1037_v20 }
 0xa22   :  { %1094 = vrot.lane.b32.xlu1 %v2016_v7, %s1871_s23 }
 0xa23   :  { %1046 = vrot.lane.b32.xlu0 %v2010_v63, %s1871_s23 }
 0xa26   :  { %1669 = vrot.lane.b32.xlu1 %v1668_v60, %s1856_s11 }
 0xa27   :  { %1674 = vrot.lane.b32.xlu0 %v1673_v57, %s1872_s1 }
 0xa96   :  { %v1036_v32 = vpop.xlane.xlu0 %1035 }
 0xa97   :  { %1729 = vrcp.f32 %v1036_v32 }
 0xa9a   :  { %v1039_v33 = vpop.xlane.xlu1 %1038  ;;  %v1047_v34 = vpop.permute.xlu0 %1046 }
 0xa9b   :  { %1731 = vrcp.f32 %v1039_v33  ;;  %v1052_v35 = vsel %vm376_vm3, %v1047_v34, 0  ;;  %v1693_v34 = vld [vmem:[%s2233_s7 + $0x18] sm:$0xff]  }
 0xa9c   :  { %1607 = vmatpush3.bf16.msra.mxu1 %v1052_v35  ;;  %v1694_v35 = vld [vmem:[%s2233_s7 + $0x10] sm:$0xff]  }
 0xa9d   :  { %1618 = vmatprep.subr.bf16.mxu1 %v1864_v42 }
 0xa9e   :  { %v1095_v7 = vpop.permute.xlu1 %1094  ;;  %v1675_v51 = vpop.permute.xlu0 %1674 }
 0xa9f   :  { %v1100_v63 = vsel %vm376_vm3, %v1095_v7, 0  ;;  %v1677_v57 = vunpack.i.h.bf16 %v1675_v51  ;;  %v1676_v61 = vunpack.i.l.bf16 %v1675_v51  ;;  %v1696_v7 = vld [vmem:[%s2233_s7] sm:$0xff]  }
 0xaa0   :  { %1613 = vmatpush3.bf16.msra.mxu0 %v1100_v63 }
 0xaa1   :  { %1626 = vmatprep.subr.bf16.mxu0 %v1864_v42 }
 0xaa2   :  { %v1670_v47 = vpop.permute.xlu1 %1669 }
 0xaa3   :  { %v1672_v49 = vunpack.i.h.bf16 %v1670_v47  ;;  %v1671_v50 = vunpack.i.l.bf16 %v1670_v47 }
 0xaa4   :  { %v1730_v54 = vpop.eup %1729 }
 0xaa5   :  { %v1041_v58 = vmul.f32 %v1730_v54, %v1726_v29  ;;  %v1167_v53 = vsel %vm249_vm2, %v2068_v59, %v1672_v49  ;;  %v1166_v55 = vsel %vm249_vm2, %v2066_v56, %v1671_v50 }
 0xaa6   :  { %v1169_v5 = vsel %vm1168_vm4, %v1166_v55, %v1676_v61  ;;  %v1170_v6 = vsel %vm1168_vm4, %v1167_v53, %v1677_v57 }
 0xaa7   :  { %v1044_v60 = vpack.c.bf16 %v1041_v58, %v1041_v58 }
 0xaa8   :  { %v1732_v36 = vpop.eup %1731 }
 0xaa9   :  { %1609 = vmatmul.mubr.msk.bf16.vlgmr.msra.gmra.mxu1 %vm249_vm2, %v1044_v60  ;;  %v1043_v37 = vmul.f32 %v1732_v36, %v1728_v31 }
 0xaaa   :  { %1622 = vmatprep.mubr.msk.bf16.mxu1 %vm1865_vm1, %v1864_v42  ;;  %1619 = vmatpush3.bf16.msra.mxu1 %v1689_v39 }
 0xaab   :  { %v1045_v38 = vpack.c.bf16 %v1043_v37, %v1043_v37  ;;  %1620 = vmatprep.subr.bf16.mxu1 %v1864_v42 }
 0xaad   :  { %1615 = vmatmul.mubr.msk.bf16.vlgmr.msra.gmra.mxu0 %vm249_vm2, %v1045_v38 }
 0xaae   :  { %1630 = vmatprep.mubr.msk.bf16.mxu0 %vm1865_vm1, %v1864_v42  ;;  %1621 = vmatpush3.bf16.msra.mxu1 %v1690_v40 }
 0xaaf   :  { %1634 = vmatprep.subr.bf16.mxu1 %v1864_v42 }
 0xb69   :  { %v1088_v41 = vpop.f32.mrf.mxu1 }
 0xb6b   :  { %v1610_v43 = vpop.f32.mrf.mxu1 }
 0xb6d   :  { %v1091_v44 = vpop.f32.mrf.mxu1  ;;  %v1136_v45 = vpop.f32.mrf.mxu0 }
 0xb6e   :  { %v1678_v48 = vpack.i.bf16 %v1136_v45, %v1088_v41 }
 0xb6f   :  { %v1611_v52 = vpop.f32.mrf.mxu1  ;;  %v1616_v46 = vpop.f32.mrf.mxu0 }
 0xb70   :  { %1679 = vrot.lane.b32.xlu1 %v1678_v48, %s1873_s24 }
 0xb71   :  { %v1139_v4 = vpop.f32.mrf.mxu0 }
 0xb73   :  { %v1617_v10 = vpop.f32.mrf.mxu0 }
 0xbe2   :  { %v1680_v62 = vpop.permute.xlu1 %1679 }
 0xbe3   :  { %v1682_v2 = vunpack.i.h.bf16 %v1680_v62  ;;  %v1681_v3 = vunpack.i.l.bf16 %v1680_v62 }
 0xbe5   :  { %v1173_v8 = vsel %vm1171_vm5, %v1170_v6, %v1682_v2  ;;  %v1172_v9 = vsel %vm1171_vm5, %v1169_v5, %v1681_v3 }
 0xbe6   :  { %v1178_v11 = vpack.c.bf16 %v1173_v8, %v1172_v9 }
 0xbe8   :  { %1623 = vmatmul.mubr.msk.bf16.vlgmr.msra.gmra.mxu1 %vm97_vm0, %v1178_v11 }
 0xbe9   :  { %1642 = vmatprep.mubr.msk.bf16.mxu1 %vm1865_vm1, %v1864_v42  ;;  %1635 = vmatpush3.bf16.msra.mxu1 %v1693_v34 }
 0xbea   :  { %1636 = vmatprep.subr.bf16.mxu1 %v1864_v42 }
 0xbed   :  { %1637 = vmatpush3.bf16.msra.mxu1 %v1694_v35 }
 0xbee   :  { %1638 = vmatprep.subr.bf16.mxu1 %v1864_v42 }
 0xca8   :  { %v1228_v59 = vpop.f32.mrf.mxu1 }
 0xca9   :  { %v2182_v56 = vadd.f32 %v1228_v59, %v1945_v0  ;;  %v1691_v0 = vld [vmem:[#allocation8 + $0x8] sm:$0xff]  }
 0xcaa   :  { %v1624_v12 = vpop.f32.mrf.mxu1  ;;  %1627 = vmatpush3.bf16.msra.mxu0 %v1691_v0 }
 0xcab   :  { %v1237_v14 = vmul.f32 %v2182_v56, %v2182_v56  ;;  %1628 = vmatprep.subr.bf16.mxu0 %v1864_v42 }
 0xcac   :  { %v1231_v15 = vpop.f32.mrf.mxu1 }
 0xcad   :  { %v2187_v16 = vadd.f32 %v1231_v15, %v1950_v1  ;;  %v1239_v18 = vsel %vm97_vm0, %v1237_v14, 0.0 }
 0xcae   :  { %1240 = vadd.xlane.f32.xlu0 %v1239_v18  ;;  %v1625_v19 = vpop.f32.mrf.mxu1  ;;  %1629 = vmatpush3.bf16.msra.mxu0 %v1692_v23 }
 0xcaf   :  { %v1238_v21 = vmul.f32 %v2187_v16, %v2187_v16 }
 0xcb1   :  { %v1242_v22 = vsel %vm97_vm0, %v1238_v21, 0.0 }
 0xcb2   :  { %1243 = vadd.xlane.f32.xlu1 %v1242_v22 }
 0xd37   :  { %v1241_v24 = vpop.xlane.xlu0 %1240 }
 0xd38   :  { %v1245_v25 = vmul.f32 0.03125, %v1241_v24 }
 0xd3a   :  { %v1247_v1 = vadd.f32 1e-06, %v1245_v25 }
 0xd3b   :  { %v1244_v26 = vpop.xlane.xlu1 %1243 }
 0xd3c   :  { %1733 = vrsqrt.f32 %v1247_v1  ;;  %v1246_v27 = vmul.f32 0.03125, %v1244_v26 }
 0xd3e   :  { %v1248_v13 = vadd.f32 1e-06, %v1246_v27 }
 0xd40   :  { %1735 = vrsqrt.f32 %v1248_v13 }
 0xd49   :  { %v1734_v28 = vpop.eup %1733 }
 0xd4a   :  { %v1251_v29 = vmul.f32 %v1734_v28, %v2182_v56 }
 0xd4c   :  { %v1257_v20 = vmul.f32 %v1972_v17, %v1251_v29 }
 0xd4d   :  { %v1736_v30 = vpop.eup %1735 }
 0xd4e   :  { %v1252_v31 = vmul.f32 %v1736_v30, %v2187_v16 }
 0xd50   :  { %v1258_v32 = vmul.f32 %v1972_v17, %v1252_v31  ;;  %v1695_v17 = vld [vmem:[%s2233_s7 + $0x8] sm:$0xff]   ;;  %s1874_s7 = smov [#allocation10]  }
 0xd51   :  { %1639 = vmatpush3.bf16.msra.mxu1 %v1695_v17 }
 0xd52   :  { %v1263_v33 = vpack.c.bf16 %v1258_v32, %v1257_v20  ;;  %1640 = vmatprep.subr.bf16.mxu1 %v1864_v42 }
 0xd54   :  { %1631 = vmatmul.mubr.msk.bf16.vlgmr.msra.gmra.mxu0 %vm97_vm0, %v1263_v33 }
 0xd55   :  { %1641 = vmatpush3.bf16.msra.mxu1 %v1696_v7 }
 0xe14   :  { %v1313_v63 = vpop.f32.mrf.mxu0 }
 0xe15   :  { %1336 = vrot.lane.b32.xlu0 %v1313_v63, %s1858_s4  ;;  %v1472_v36 = vmul.f32 -1.442695, %v1313_v63 }
 0xe16   :  { %v1632_v54 = vpop.f32.mrf.mxu0 }
 0xe17   :  { %1737 = vpow2.f32 %v1472_v36 }
 0xe18   :  { %v1316_v58 = vpop.f32.mrf.mxu0 }
 0xe19   :  { %1338 = vrot.lane.b32.xlu1 %v1316_v58, %s1858_s4  ;;  %v1473_v37 = vmul.f32 -1.442695, %v1316_v58  ;;  %s1431_s4 = sshll.u32 %s1874_s7, 4  ;;  %s1432_s4 = int_to_ptr.vmem [resolvable:$true] %s1431_s4 }
 0xe1a   :  { %v1633_v60 = vpop.f32.mrf.mxu0  ;;  %s1825_s30 = scalar_lea.vmem %s1432_s4, 256  ;;  %p1830_p7 = scmp.lt.s32.totalorder %s1432_s4, %s1432_s4 }
 0xe1b   :  { %1739 = vpow2.f32 %v1473_v37  ;;  %p1826_p6 = scmp.ne.s32.totalorder %s1432_s4, %s1825_s30  ;;  %p1831_p8 = scmp.lt.s32.totalorder %s1825_s30, %s1825_s30 }
 0xe1d   :  { %p1832_p9 = por %p1831_p8, %p1830_p7 }
 0xe1f   :  { %p1833_p10 = pnand %p1832_p9, %p1826_p6 }
 0xe24   :  { %v1738_v38 = vpop.eup %1737 }
 0xe25   :  { %v1326_v42 = vadd.f32 1.0, %v1738_v38 }
 0xe27   :  { %1741 = vrcp.f32 %v1326_v42 }
 0xe28   :  { %v1740_v39 = vpop.eup %1739 }
 0xe29   :  { %v1327_v40 = vadd.f32 1.0, %v1740_v39 }
 0xe2b   :  { %1743 = vrcp.f32 %v1327_v40 }
 0xe34   :  { %v1742_v41 = vpop.eup %1741 }
 0xe35   :  { %v1332_v45 = vmul.f32 %v1742_v41, %v1313_v63 }
 0xe38   :  { %v1744_v43 = vpop.eup %1743 }
 0xe39   :  { %v1333_v48 = vmul.f32 %v1744_v43, %v1316_v58 }
 0xe87   :  { %v1337_v44 = vpop.permute.xlu0 %1336 }
 0xe88   :  { %v1342_v46 = vmul.f32 %v1337_v44, %v1332_v45 }
 0xe8b   :  { %v1339_v52 = vpop.permute.xlu1 %1338 }
 0xe8c   :  { %v1343_v4 = vmul.f32 %v1339_v52, %v1333_v48 }
 0xe8e   :  { %v1352_v10 = vpack.c.bf16 %v1343_v4, %v1342_v46 }
 0xe90   :  { %1643 = vmatmul.mubr.msk.bf16.vlgmr.msra.gmra.mxu1 %vm1377_vm6, %v1352_v10 }
 0xf50   :  { %v1415_v47 = vpop.f32.mrf.mxu1 }
 0xf51   :  { %v1422_v49 = vadd.f32 %v1415_v47, %v2182_v56 }
 0xf52   :  { %v1644_v50 = vpop.f32.mrf.mxu1 }
 0xf53   :  { %1424 = vst.msk [vmem:[#allocation10] sm:$0xff] %vm97_vm0, %v1422_v49 }
 0xf54   :  { %v1418_v51 = vpop.f32.mrf.mxu1 }
 0xf55   :  { %v1423_v53 = vadd.f32 %v1418_v51, %v2187_v16 }
 0xf56   :  { %v1645_v55 = vpop.f32.mrf.mxu1 }
 0xf57   :  { %1425 = vst.msk [vmem:[#allocation10 + $0x8] sm:$0xff] %vm97_vm0, %v1423_v53 }
 0xf58   :  { %1836 = shalt.err (!%p1833_p10)
}
 0xf59   :  { %1437 = dma.vmem_to_hbm [thread:$0]  %s1432_s4, 256, %s2234_s8, [#allocation4], %s1855_s10, %s1855_s10, %s1856_s11  }
 0xf5a   :  { %1851 = dma.done.wait [#allocation4], 256  }
 0xf5b   :  { %1852 = vsyncadd [#allocation4], 4294967040 }
 0xf5c   :  { %1441 = vsyncpa [#allocation3], 1 }
 0xf5d   :  { %1442 = vsyncpa [#allocation6], 1 }
 0xf5e   :  { %1443 = vsyncpa [#allocation9], 1 }
 0xf5f   :  { %1444 = vsyncpa [#allocation4], 1 }

</bundles_post_ra>
